<compile_context>
chip_gen: v7x
topology: tpu7x:2x2x1
jax: 0.10.0
libtpu: 0.0.40
codegen_flags: <defaults>
</compile_context>

<pallas_src>
import functools

import jax
import jax.numpy as jnp
from jax.experimental import pallas as pl
from jax.experimental.pallas import tpu as pltpu

_LANE = 128
_SUBLANE = 8


def _round_up(x, m):
    return ((x + m - 1) // m) * m


def _device_kind():
    try:
        return jax.devices()[0].device_kind.lower()
    except Exception:
        return ""


def _gaussian_smearing_kernel(dist_ref, out_ref, *, coeff, start, delta, g, tb,
                              exp_dtype):
    # dist_ref : (TB, HWt)      float32
    # out_ref  : (TB, G, HWt)   out_dtype
    # Gaussian centers in-registers: offset[k] = start + k * delta.
    g_idx = jax.lax.broadcasted_iota(jnp.int32, (g, 1), 0).astype(jnp.float32)
    off = start + g_idx * delta                               # (G, 1)
    for b in range(tb):                                       # TB <= 8, static unroll
        row = dist_ref[pl.ds(b, 1), :]                        # (1, HWt), loaded per row
        diff = row - off                                      # (G, HWt) f32
        arg = coeff * diff * diff                             # f32 squaring on all chips
        out_ref[b] = jnp.exp(arg.astype(exp_dtype)).astype(out_ref.dtype)


def gaussian_smearing(dist, start=0.0, stop=5.0, num_gaussians=50,
                      out_dtype=jnp.bfloat16):
    """dist: (B, 1, H, W) -> (B, num_gaussians, H, W), matching the PyTorch module."""
    assert num_gaussians >= 2, "GaussianSmearing needs num_gaussians >= 2"
    B, C, H, W = dist.shape
    assert C == 1, "GaussianSmearing expects channel dim == 1"
    G = int(num_gaussians)
    HW = H * W

    delta = (float(stop) - float(start)) / (G - 1)
    coeff = -0.5 / (delta ** 2)

    out_dtype = jnp.dtype(out_dtype)
    out_itemsize = out_dtype.itemsize

    kind = _device_kind()
    old_gen = any(v in kind for v in ("v2", "v3", "v4", "v5"))
    big_vmem = any(v in kind for v in ("v5", "v6"))          # 128 MiB VMEM chips
    # bf16 exp (EUP) only where the hardware has a bf16 EUP path (v6e / v7x).
    use_bf16_exp = (out_dtype == jnp.bfloat16 and kind.startswith("tpu")
                    and not old_gen)
    exp_dtype = jnp.bfloat16 if use_bf16_exp else jnp.float32

    # ---- tiling (exact logical shapes; Pallas handles ragged edge blocks) ----
    TB = _SUBLANE if B >= _SUBLANE else B
    target_out_block = (12 << 20) if big_vmem else (6 << 20)
    bytes_per_hw_col = TB * G * out_itemsize
    hw_cap = max(_LANE, (target_out_block // bytes_per_hw_col) // _LANE * _LANE)
    HW_tile = min(hw_cap, _round_up(HW, _LANE))
    # Guarantee >= 2 steps on a 'parallel' grid axis (v7x has 2 TensorCores)
    # when the batch axis collapses to a single step.
    if pl.cdiv(B, TB) == 1 and pl.cdiv(HW, HW_tile) == 1 and HW > _LANE:
        HW_tile = _round_up(pl.cdiv(HW, 2), _LANE)

    grid = (pl.cdiv(B, TB), pl.cdiv(HW, HW_tile))

    dist_flat = dist.reshape(B, HW).astype(jnp.float32)      # free reshape; cast only if needed

    kernel = functools.partial(
        _gaussian_smearing_kernel,
        coeff=float(coeff), start=float(start), delta=float(delta),
        g=G, tb=TB, exp_dtype=exp_dtype)

    in_block_bytes = TB * HW_tile * 4
    out_block_bytes = TB * G * HW_tile * out_itemsize
    row_tmp_bytes = G * HW_tile * 4                           # per-row f32 intermediates
    vmem_limit = (2 * (in_block_bytes + out_block_bytes)
                  + 4 * row_tmp_bytes + (2 << 20))
    vmem_limit = int(min(max(vmem_limit, 16 << 20), 48 << 20))

    out_flat = pl.pallas_call(
        kernel,
        out_shape=jax.ShapeDtypeStruct((B, G, HW), out_dtype),
        grid_spec=pltpu.PrefetchScalarGridSpec(
            num_scalar_prefetch=0,
            grid=grid,
            in_specs=[pl.BlockSpec((TB, HW_tile), lambda bi, hi: (bi, hi))],
            out_specs=pl.BlockSpec((TB, G, HW_tile), lambda bi, hi: (bi, 0, hi)),
        ),
        compiler_params=pltpu.CompilerParams(
            dimension_semantics=("parallel", "parallel"),
            vmem_limit_bytes=vmem_limit,
        ),
        cost_estimate=pl.CostEstimate(
            flops=int(3 * B * G * HW),
            transcendentals=int(B * G * HW),
            bytes_accessed=int(4 * B * HW + out_itemsize * B * G * HW),
        ),
    )(dist_flat)

    # (B, G, HW) -> (B, G, H, W) is a free metadata reshape (no copy).
    return out_flat.reshape(B, G, H, W)


def reference(dist, start=0.0, stop=5.0, num_gaussians=50):
    # Plain-JAX mirror of the PyTorch forward.
    offset = jnp.linspace(start, stop, num_gaussians, dtype=jnp.float32)
    delta = (stop - start) / (num_gaussians - 1)
    coeff = -0.5 / delta ** 2
    diff = dist - offset.reshape(1, -1, 1, 1)
    return jnp.exp(coeff * diff * diff)


if __name__ == "__main__":
    B, H, W = 2, 16, 16
    num_gaussians = 50

    key = jax.random.PRNGKey(0)
    # distances in [0, 5), shape (B, 1, H, W) — NCHW with C == 1
    dist = jax.random.uniform(key, (B, 1, H, W), dtype=jnp.float32) * 5.0

    ref = reference(dist, 0.0, 5.0, num_gaussians)

    # f32 path: tight check against the plain-JAX mirror of the PyTorch forward.
    out_f32 = gaussian_smearing(dist, 0.0, 5.0, num_gaussians,
                                out_dtype=jnp.float32)
    out_f32 = jax.block_until_ready(out_f32)
    assert out_f32.shape == (B, num_gaussians, H, W)
    assert jnp.allclose(out_f32, ref, atol=2e-5, rtol=1e-5)

    # Default path (bf16 output, halved HBM writeback).
    out_bf16 = gaussian_smearing(dist, 0.0, 5.0, num_gaussians)
    out_bf16 = jax.block_until_ready(out_bf16)
    assert out_bf16.shape == (B, num_gaussians, H, W)
    assert out_bf16.dtype == jnp.bfloat16
    assert jnp.allclose(out_bf16.astype(jnp.float32), ref, atol=1e-2, rtol=1e-2)

    print("KERNEL_OK")
</pallas_src>

<mosaic_0001>
module attributes {stable_mosaic.version = 11 : i64} {
  func.func @_gaussian_smearing_kernel(%arg0: i32, %arg1: i32, %arg2: memref<2x128xf32, #tpu.memory_space<vmem>>, %arg3: memref<2x50x128xf32, #tpu.memory_space<vmem>>) attributes {dimension_semantics = [#tpu.dimension_semantics<parallel>, #tpu.dimension_semantics<parallel>], iteration_bounds = array<i64: 1, 2>, scalar_prefetch = 0 : i64, scratch_operands = 0 : i64, tpu.core_type = #tpu.core_type<tc>, window_params = [{transform_indices = @transform_0, window_bounds = array<i64: 2, 128>}, {transform_indices = @transform_1, window_bounds = array<i64: 2, 50, 128>}]} {
    %0 = tpu.iota {dimensions = array<i32: 0>} : vector<50x1xi32>
    %1 = arith.sitofp %0 : vector<50x1xi32> to vector<50x1xf32>
    %cst = arith.constant 0.10204082 : f32
    %2 = vector.broadcast %cst : f32 to vector<50x1xf32>
    %3 = arith.mulf %1, %2 : vector<50x1xf32>
    %cst_0 = arith.constant 0.000000e+00 : f32
    %4 = vector.broadcast %cst_0 : f32 to vector<50x1xf32>
    %5 = arith.addf %4, %3 : vector<50x1xf32>
    %c0 = arith.constant 0 : index
    %c0_1 = arith.constant 0 : index
    %6 = vector.load %arg2[%c0, %c0_1] : memref<2x128xf32, #tpu.memory_space<vmem>>, vector<1x128xf32>
    %7 = vector.broadcast %6 : vector<1x128xf32> to vector<50x128xf32>
    %8 = vector.broadcast %5 : vector<50x1xf32> to vector<50x128xf32>
    %9 = arith.subf %7, %8 : vector<50x128xf32>
    %cst_2 = arith.constant -4.802000e+01 : f32
    %10 = vector.broadcast %cst_2 : f32 to vector<50x128xf32>
    %11 = arith.mulf %10, %9 : vector<50x128xf32>
    %12 = arith.mulf %11, %9 : vector<50x128xf32>
    %13 = math.exp %12 : vector<50x128xf32>
    %c0_3 = arith.constant 0 : index
    %c0_4 = arith.constant 0 : index
    %c0_5 = arith.constant 0 : index
    %14 = vector.load %arg3[%c0_3, %c0_4, %c0_5] : memref<2x50x128xf32, #tpu.memory_space<vmem>>, vector<1x50x128xf32>
    %15 = vector.shape_cast %14 : vector<1x50x128xf32> to vector<50x128xf32>
    %16 = vector.shape_cast %13 : vector<50x128xf32> to vector<1x50x128xf32>
    tpu.vector_store %arg3[%c0_3, %c0_4, %c0_5], %16 {strides = array<i32>} : memref<2x50x128xf32, #tpu.memory_space<vmem>>, vector<1x50x128xf32>,
    %c1 = arith.constant 1 : index
    %c0_6 = arith.constant 0 : index
    %17 = vector.load %arg2[%c1, %c0_6] : memref<2x128xf32, #tpu.memory_space<vmem>>, vector<1x128xf32>
    %18 = vector.broadcast %17 : vector<1x128xf32> to vector<50x128xf32>
    %19 = vector.broadcast %5 : vector<50x1xf32> to vector<50x128xf32>
    %20 = arith.subf %18, %19 : vector<50x128xf32>
    %cst_7 = arith.constant -4.802000e+01 : f32
    %21 = vector.broadcast %cst_7 : f32 to vector<50x128xf32>
    %22 = arith.mulf %21, %20 : vector<50x128xf32>
    %23 = arith.mulf %22, %20 : vector<50x128xf32>
    %24 = math.exp %23 : vector<50x128xf32>
    %c1_8 = arith.constant 1 : index
    %c0_9 = arith.constant 0 : index
    %c0_10 = arith.constant 0 : index
    %25 = vector.load %arg3[%c1_8, %c0_9, %c0_10] : memref<2x50x128xf32, #tpu.memory_space<vmem>>, vector<1x50x128xf32>
    %26 = vector.shape_cast %25 : vector<1x50x128xf32> to vector<50x128xf32>
    %27 = vector.shape_cast %24 : vector<50x128xf32> to vector<1x50x128xf32>
    tpu.vector_store %arg3[%c1_8, %c0_9, %c0_10], %27 {strides = array<i32>} : memref<2x50x128xf32, #tpu.memory_space<vmem>>, vector<1x50x128xf32>,
    return
  }
  func.func @transform_0(%arg0: i32, %arg1: i32) -> (i32, i32) {
    %c0_i32 = arith.constant 0 : i32
    return %arg0, %arg1 : i32, i32
  }
  func.func @transform_1(%arg0: i32, %arg1: i32) -> (i32, i32, i32) {
    %c0_i32 = arith.constant 0 : i32
    %c0_i32_0 = arith.constant 0 : i32
    return %arg0, %c0_i32, %arg1 : i32, i32, i32
  }
}

</mosaic_0001>

<bundles_post_ra>
// kernel: tpu_custom_call.1
= control target key start
LH: loop header
LB: loop body
LE: loop exit
PB: predicated region body
PF: predicated region fallthrough
CT: control target
= control target key end

     0   :  { %6 = vsyncpa [#allocation3], 0  ;;  %s803_s0 = inlined_call_operand.hbm [shape: f32[2,256], index: 0, kind: input, shape index: {}]   ;;  %s804_s1 = inlined_call_operand.vmem [shape: f32[2,50,256], index: 1, kind: output, shape index: {}]  }
   0x1   :  { %8 = vsyncpa [#allocation3 + $0x1], 0  ;;  %s638_s6 = smov 0   ;;  %s640_s7 = smov 0  }
   0x2   :  { %s642_s8 = smov 0   ;;  %s644_s9 = smov 0  }
   0x3   :  { %s646_s10 = smov 0   ;;  %s648_s11 = smov 0  }
   0x4 LB: > { %s441_s12 = sadd.s32 4294967295, %s625_s11   ;;  %s23_s13 = sadd.s32 1, %s621_s10  ;;  %s625_s11 = sphi %s648_s11, %s14_s11   ;;  %s621_s10 = sphi %s646_s10, %s816_s10   ;;  %s617_s9 = sphi %s644_s9, %s815_s9   ;;  %s613_s8 = sphi %s642_s8, %s814_s8   ;;  %s609_s7 = sphi %s640_s7, %s813_s7   ;;  %s605_s6 = sphi %s638_s6, %s812_s6  }
   0x5   : > { %p24_p0 = scmp.ge.s32.totalorder %s23_s13, 2  ;;  %s35_s14 = sadd.s32 1, %s613_s8 }
   0x6   : > { %p42_p1 = scmp.ne.s32.totalorder %s613_s8, %s609_s7  ;;  %p43_p2 = scmp.eq.s32.totalorder %s625_s11, 0 }
   0x7   : > { %s818_s13 = smov (%p24_p0, %s23_s13), 0  ;;  %p48_p4 = scmp.ne.s32.totalorder %s609_s7, %s605_s6 }
   0x8   : > { %p674_p3 = por %p43_p2, %p42_p1  ;;  %s31_s16 = ssub.s32 %s621_s10, %s818_s13 }
   0x9   : > { %p49_p5 = scmp.eq.s32.totalorder %s441_s12, 0  ;;  %p33_p6 = scmp.eq.s32.totalorder %s31_s16, 0 }
   0xa   : > { %p74_p7 = scmp.eq.s32.totalorder %s441_s12, 1  ;;  %p468_p10 = scmp.lt.s32.totalorder %s625_s11, 2 }
   0xb   : > { %p681_p8 = por %p49_p5, %p48_p4  ;;  %s100_s20 = sand.u32 1, %s613_s8  }
   0xc   : > { %s686_s18 = scalar_select %p33_p6, %s613_s8, %s35_s14  }
   0xd   : > { %p688_p9 = por %p74_p7, %p42_p1  ;;  %s446_s21 = sshll.u32 %s621_s10, 5 }
   0xe   : > { %s445_s22 = sshll.u32 %s100_s20, 1  ;;  %s698_s25 = scalar_lea.hbm %s803_s0, %s446_s21 }
   0xf   : > { %s807_s19 = scalar_select %p688_p9, 1, 0 }
  0x10   : > { %s104_s26 = scalar_lea.vmem [#allocation2], %s445_s22  ;;  %p702_p11 = pnand %p468_p10, %p674_p3 }
  0x11   : > { %s113_s27 = sshll.u32 %s104_s26, 4  ;;  %s101_s29 = scalar_lea.sflag [#allocation3], %s100_s20  ;;  %s706_s27 = int_to_ptr.vmem [resolvable:$true] %s113_s27 }
  0x12   : > { %s545_s30 = scalar_lea.hbm %s698_s25, 32  ;;  %p547_p1 = pneg %p702_p11 }
  0x13   : > { %p546_p0 = scmp.ne.s32.totalorder %s698_s25, %s545_s30  ;;  %s550_s4 = scalar_lea.hbm %s803_s0, 64 }
  0x14   : > { %p551_p3 = scmp.lt.u32.totalorder %s698_s25, %s803_s0  ;;  %p552_p5 = scmp.lt.u32.totalorder %s550_s4, %s545_s30 }
  0x15   : > { %p548_p2 = pnand %p547_p1, %p546_p0  ;;  %p554_p7 = scmp.lt.u32.totalorder %s545_s30, %s698_s25 }
  0x16   : > { %p553_p6 = por %p552_p5, %p551_p3 }
  0x17   : > { %p549_p4 = pneg %p548_p2 }
  0x18   : > { %p555_p10 = por %p554_p7, %p553_p6 }
  0x1a   : > { %p556_p12 = pnand %p555_p10, %p549_p4 }
  0x1c   : > { %559 = shalt.err (!%p556_p12)
}
  0x1d   : > { %s560_s12 = scalar_lea.vmem %s706_s27, 32  ;;  %s627_s14 = smov [#allocation2]  }
  0x1e   : > { %p561_p0 = scmp.ne.s32.totalorder %s706_s27, %s560_s12  ;;  %s565_s15 = sshll.u32 %s627_s14, 4  ;;  %s566_s15 = int_to_ptr.vmem [resolvable:$false] %s565_s15 }
  0x1f   : > { %s567_s16 = scalar_lea.vmem %s566_s15, 64  ;;  %p568_p9 = scmp.lt.s32.totalorder %s706_s27, %s566_s15 }
  0x20   : > { %p563_p2 = pnand %p561_p0, %p547_p1  ;;  %p569_p3 = scmp.lt.s32.totalorder %s567_s16, %s560_s12 }
  0x22   : > { %p564_p13 = pneg %p563_p2  ;;  %p570_p5 = por %p569_p3, %p568_p9 }
  0x24   : > { %p571_p6 = pnand %p570_p5, %p564_p13 }
  0x26   : > { %574 = shalt.err (!%p571_p6)
}
  0x27   : > { %467 = dma.hbm_to_vmem [thread:$0]  (!%p702_p11), %s698_s25, 32, %s706_s27, %s101_s29  }
  0x28   : > { %p809_p12 = scmp.lt.s32.totalorder %s625_s11, 3  ;;  %p810_p4 = scmp.ge.s32.totalorder %s625_s11, 1 }
  0x2a   : > { %p119_p1 = pnand %p810_p4, %p809_p12 }
  0x2b   : > { %s740_s20 = sand.u32 (!%p119_p1), 1, %s609_s7  }
  0x2c   : > { %122 = sbr.rel (%p119_p1) target bundleno = 103 (0x67), region = 24  ;;  %s448_s21 = sshll.u32 (!%p119_p1), %s740_s20, 1 }
  0x2d   : > { %s125_s22 = scalar_lea.sflag (!%p119_p1), [#allocation3], %s740_s20  ;;  %s128_s23 = scalar_lea.vmem (!%p119_p1), [#allocation2], %s448_s21 }
  0x33   : > { %600 = dma.done.wait (%p681_p8), %s125_s22, 32  }
  0x34   : > { %602 = vsyncadd (%p681_p8), %s125_s22, 4294967264  ;;  %v147_v0 = vlaneseq  ;;  %v449_v13 = vld [vmem:[%s128_s23] ss:$0 sm:$0xff]  ;;  %v450_v17 = vld [vmem:[%s128_s23 + $0x1] ss:$0 sm:$0xff]  ;;  %s461_s17 = smul.u32 112, %s740_s20 }
  0x35   : > { %p811_p8 = scmp.ne.s32.totalorder %s807_s19, 0 }
  0x36   : > { %v148_v1 = vshrl.u32 %v147_v0, 7  ;;  %s749_s24 = scalar_lea.vmem [#allocation4], %s461_s17  ;;  %s458_s25 = sshll.u32 (%p811_p8), %s617_s9, 3 }
  0x37   : > { %s282_s28 = scalar_lea.vmem (%p811_p8), %s804_s1, %s458_s25 }
  0x38   : > { %v155_v2 = vcvt.s32.f32 %v148_v1  ;;  %v149_v3 = vadd.s32 8, %v148_v1  ;;  %v150_v4 = vadd.s32 16, %v148_v1  ;;  %v151_v5 = vadd.s32 24, %v148_v1 }
  0x39   : > { %v152_v6 = vadd.s32 32, %v148_v1  ;;  %v153_v7 = vadd.s32 40, %v148_v1  ;;  %v154_v8 = vadd.s32 48, %v148_v1 }
  0x3a   : > { %v162_v9 = vmul.f32 0.10204082, %v155_v2  ;;  %v156_v10 = vcvt.s32.f32 %v149_v3  ;;  %v157_v11 = vcvt.s32.f32 %v150_v4  ;;  %v158_v12 = vcvt.s32.f32 %v151_v5 }
  0x3b   : > { %v159_v14 = vcvt.s32.f32 %v152_v6  ;;  %v160_v15 = vcvt.s32.f32 %v153_v7  ;;  %v161_v16 = vcvt.s32.f32 %v154_v8 }
  0x3c   : > { %v181_v18 = vsub.f32 %v449_v13, %v162_v9  ;;  %v163_v19 = vmul.f32 0.10204082, %v156_v10  ;;  %v164_v20 = vmul.f32 0.10204082, %v157_v11  ;;  %v165_v21 = vmul.f32 0.10204082, %v158_v12 }
  0x3d   : > { %v166_v22 = vmul.f32 0.10204082, %v159_v14  ;;  %v167_v23 = vmul.f32 0.10204082, %v160_v15  ;;  %v168_v24 = vmul.f32 0.10204082, %v161_v16  ;;  %v228_v25 = vsub.f32 %v450_v17, %v162_v9 }
  0x3e   : > { %v188_v26 = vmul.f32 -48.02, %v181_v18  ;;  %v182_v27 = vsub.f32 %v449_v13, %v163_v19  ;;  %v183_v28 = vsub.f32 %v449_v13, %v164_v20  ;;  %v184_v29 = vsub.f32 %v449_v13, %v165_v21 }
  0x3f   : > { %v185_v30 = vsub.f32 %v449_v13, %v166_v22  ;;  %v186_v31 = vsub.f32 %v449_v13, %v167_v23  ;;  %v187_v32 = vsub.f32 %v449_v13, %v168_v24  ;;  %v235_v33 = vmul.f32 -48.02, %v228_v25 }
  0x40   : > { %v195_v34 = vmul.f32 %v188_v26, %v181_v18  ;;  %v189_v35 = vmul.f32 -48.02, %v182_v27  ;;  %v190_v36 = vmul.f32 -48.02, %v183_v28  ;;  %v191_v37 = vmul.f32 -48.02, %v184_v29 }
  0x41   : > { %v192_v38 = vmul.f32 -48.02, %v185_v30  ;;  %v193_v39 = vmul.f32 -48.02, %v186_v31  ;;  %v194_v40 = vmul.f32 -48.02, %v187_v32  ;;  %v242_v41 = vmul.f32 %v235_v33, %v228_v25 }
  0x42   : > { %v202_v42 = vmul.f32 1.442695, %v195_v34  ;;  %v196_v43 = vmul.f32 %v189_v35, %v182_v27  ;;  %v197_v44 = vmul.f32 %v190_v36, %v183_v28  ;;  %v198_v45 = vmul.f32 %v191_v37, %v184_v29 }
  0x43   : > { %v199_v46 = vmul.f32 %v192_v38, %v185_v30  ;;  %v200_v47 = vmul.f32 %v193_v39, %v186_v31  ;;  %v201_v48 = vmul.f32 %v194_v40, %v187_v32  ;;  %v249_v49 = vmul.f32 1.442695, %v242_v41 }
  0x44   : > { %517 = vpow2.f32 %v202_v42  ;;  %v204_v50 = vmul.f32 1.442695, %v196_v43  ;;  %v206_v51 = vmul.f32 1.442695, %v197_v44  ;;  %v208_v52 = vmul.f32 1.442695, %v198_v45 }
  0x45   : > { %v210_v53 = vmul.f32 1.442695, %v199_v46  ;;  %v212_v54 = vmul.f32 1.442695, %v200_v47  ;;  %v214_v55 = vmul.f32 1.442695, %v201_v48  ;;  %519 = vpow2.f32 %v249_v49 }
  0x46   : > { %521 = vpow2.f32 %v204_v50  ;;  %v229_v56 = vsub.f32 %v450_v17, %v163_v19  ;;  %v230_v57 = vsub.f32 %v450_v17, %v164_v20  ;;  %v231_v58 = vsub.f32 %v450_v17, %v165_v21 }
  0x47   : > { %523 = vpow2.f32 %v206_v51  ;;  %v232_v59 = vsub.f32 %v450_v17, %v166_v22  ;;  %v233_v60 = vsub.f32 %v450_v17, %v167_v23  ;;  %v234_v61 = vsub.f32 %v450_v17, %v168_v24 }
  0x48   : > { %525 = vpow2.f32 %v208_v52  ;;  %v236_v62 = vmul.f32 -48.02, %v229_v56  ;;  %v237_v63 = vmul.f32 -48.02, %v230_v57  ;;  %v238_v0 = vmul.f32 -48.02, %v231_v58 }
  0x49   : > { %527 = vpow2.f32 %v210_v53  ;;  %v239_v1 = vmul.f32 -48.02, %v232_v59  ;;  %v240_v2 = vmul.f32 -48.02, %v233_v60  ;;  %v241_v3 = vmul.f32 -48.02, %v234_v61 }
  0x4a   : > { %529 = vpow2.f32 %v212_v54  ;;  %v243_v4 = vmul.f32 %v236_v62, %v229_v56  ;;  %v244_v5 = vmul.f32 %v237_v63, %v230_v57  ;;  %v245_v6 = vmul.f32 %v238_v0, %v231_v58 }
  0x4b   : > { %531 = vpow2.f32 %v214_v55  ;;  %v246_v7 = vmul.f32 %v239_v1, %v232_v59  ;;  %v247_v8 = vmul.f32 %v240_v2, %v233_v60  ;;  %v248_v9 = vmul.f32 %v241_v3, %v234_v61 }
  0x4c   : > { %v251_v10 = vmul.f32 1.442695, %v243_v4  ;;  %v253_v11 = vmul.f32 1.442695, %v244_v5  ;;  %v255_v12 = vmul.f32 1.442695, %v245_v6 }
  0x4d   : > { %v257_v13 = vmul.f32 1.442695, %v246_v7  ;;  %v259_v15 = vmul.f32 1.442695, %v247_v8  ;;  %v261_v17 = vmul.f32 1.442695, %v248_v9 }
  0x4e   : > { %v518_v14 = vpop.eup %517  ;;  %533 = vpow2.f32 %v251_v10 }
  0x4f   : > { %v520_v16 = vpop.eup %519  ;;  %216 = vst [vmem:[%s749_s24] sm:$0xff] %v518_v14  ;;  %535 = vpow2.f32 %v253_v11 }
  0x50   : > { %v522_v18 = vpop.eup %521  ;;  %451 = vst [vmem:[%s749_s24 + $0x38] sm:$0xff] %v520_v16  ;;  %537 = vpow2.f32 %v255_v12 }
  0x51   : > { %v524_v19 = vpop.eup %523  ;;  %217 = vst [vmem:[%s749_s24 + $0x8] sm:$0xff] %v522_v18  ;;  %539 = vpow2.f32 %v257_v13 }
  0x52   : > { %v526_v20 = vpop.eup %525  ;;  %218 = vst [vmem:[%s749_s24 + $0x10] sm:$0xff] %v524_v19  ;;  %541 = vpow2.f32 %v259_v15 }
  0x53   : > { %v528_v21 = vpop.eup %527  ;;  %219 = vst [vmem:[%s749_s24 + $0x18] sm:$0xff] %v526_v20  ;;  %543 = vpow2.f32 %v261_v17 }
  0x54   : > { %v530_v22 = vpop.eup %529  ;;  %220 = vst [vmem:[%s749_s24 + $0x20] sm:$0xff] %v528_v21 }
  0x55   : > { %v532_v23 = vpop.eup %531  ;;  %221 = vst [vmem:[%s749_s24 + $0x28] sm:$0xff] %v530_v22 }
  0x56   : > { %222 = vst [vmem:[%s749_s24 + $0x30] sm:$0x3] %v532_v23  ;;  %v336_v30 = vld [vmem:[%s749_s24] sm:$0xff] (%p811_p8) }
  0x57   : > { %337 = vst [vmem:[%s282_s28] sm:$0xff] (%p811_p8), %v336_v30  ;;  %v350_v37 = vld [vmem:[%s749_s24 + $0x38] sm:$0xff] (%p811_p8) }
  0x58   : > { %v534_v24 = vpop.eup %533  ;;  %277 = sbr.rel (!%p811_p8) target bundleno = 103 (0x67), region = 32  ;;  %v338_v31 = vld [vmem:[%s749_s24 + $0x8] sm:$0xff] (%p811_p8)  ;;  %351 = vst [vmem:[%s282_s28 + $0x70] sm:$0xff] (%p811_p8), %v350_v37 }
  0x59   : > { %v536_v25 = vpop.eup %535  ;;  %452 = vst [vmem:[%s749_s24 + $0x40] sm:$0xff] %v534_v24  ;;  %v340_v32 = vld [vmem:[%s749_s24 + $0x10] sm:$0xff] (%p811_p8)  ;;  %339 = vst [vmem:[%s282_s28 + $0x10] sm:$0xff] (%p811_p8), %v338_v31 }
  0x5a   : > { %v538_v26 = vpop.eup %537  ;;  %453 = vst [vmem:[%s749_s24 + $0x48] sm:$0xff] %v536_v25  ;;  %v342_v33 = vld [vmem:[%s749_s24 + $0x18] sm:$0xff] (%p811_p8)  ;;  %341 = vst [vmem:[%s282_s28 + $0x20] sm:$0xff] (%p811_p8), %v340_v32 }
  0x5b   : > { %v540_v27 = vpop.eup %539  ;;  %454 = vst [vmem:[%s749_s24 + $0x50] sm:$0xff] %v538_v26  ;;  %v344_v34 = vld [vmem:[%s749_s24 + $0x20] sm:$0xff] (%p811_p8)  ;;  %343 = vst [vmem:[%s282_s28 + $0x30] sm:$0xff] (%p811_p8), %v342_v33 }
  0x5c   : > { %v542_v28 = vpop.eup %541  ;;  %455 = vst [vmem:[%s749_s24 + $0x58] sm:$0xff] %v540_v27  ;;  %v346_v35 = vld [vmem:[%s749_s24 + $0x28] sm:$0xff] (%p811_p8)  ;;  %345 = vst [vmem:[%s282_s28 + $0x40] sm:$0xff] (%p811_p8), %v344_v34 }
  0x5d   : > { %v544_v29 = vpop.eup %543  ;;  %456 = vst [vmem:[%s749_s24 + $0x60] sm:$0xff] %v542_v28  ;;  %347 = vst [vmem:[%s282_s28 + $0x50] sm:$0xff] (%p811_p8), %v346_v35  ;;  %v348_v36 = vld [vmem:[%s749_s24 + $0x30] sm:$0xff] (%p811_p8) }
  0x5e   : > { %457 = vst [vmem:[%s749_s24 + $0x68] sm:$0x3] %v544_v29  ;;  %349 = vst [vmem:[%s282_s28 + $0x60] sm:$0xff] (%p811_p8), %v348_v36 }
  0x60   : > { %v352_v38 = vld [vmem:[%s749_s24 + $0x40] sm:$0xff] }
  0x61   : > { %353 = vst [vmem:[%s282_s28 + $0x80] sm:$0xff] %v352_v38  ;;  %v354_v39 = vld [vmem:[%s749_s24 + $0x48] sm:$0xff] }
  0x62   : > { %v356_v40 = vld [vmem:[%s749_s24 + $0x50] sm:$0xff]  ;;  %355 = vst [vmem:[%s282_s28 + $0x90] sm:$0xff] %v354_v39 }
  0x63   : > { %v358_v41 = vld [vmem:[%s749_s24 + $0x58] sm:$0xff]  ;;  %357 = vst [vmem:[%s282_s28 + $0xa0] sm:$0xff] %v356_v40 }
  0x64   : > { %359 = vst [vmem:[%s282_s28 + $0xb0] sm:$0xff] %v358_v41  ;;  %v360_v42 = vld [vmem:[%s749_s24 + $0x60] sm:$0xff] }
  0x65   : > { %v362_v43 = vld [vmem:[%s749_s24 + $0x68] sm:$0xff]  ;;  %361 = vst [vmem:[%s282_s28 + $0xc0] sm:$0xff] %v360_v42 }
  0x66   : > { %363 = vst [vmem:[%s282_s28 + $0xd0] sm:$0xff] %v362_v43 }
  0x67 PF: > { %s14_s11 = sadd.s32 1, %s625_s11   ;;  %s812_s6 = smov %s609_s7 }
  0x68   : > { %p11_p9 = scmp.ge.s32.totalorder %s14_s11, 4   ;;  %s813_s7 = smov %s613_s8 }
  0x69   : > { %s814_s8 = smov %s686_s18  ;;  %s815_s9 = smov %s621_s10 }
  0x6a   : > { %s816_s10 = smov %s818_s13  ;;  %13 = sbr.rel (!%p11_p9) target bundleno = 4 (0x4), region = 103 }
  0x71   :  { %379 = vsyncpa [#allocation3], 1 }
  0x72   :  { %381 = vsyncpa [#allocation3 + $0x1], 1 }

</bundles_post_ra>
